<compile_context>
chip_gen: v5e
topology: v5e:2x2
jax: 0.10.0
libtpu: 0.0.40
codegen_flags: <defaults>
</compile_context>

<pallas_src>
import functools

import jax
import jax.numpy as jnp
from jax.experimental import pallas as pl
from jax.experimental.pallas import tpu as pltpu

LANES = 128
# Row granularity for non-full-dim tiles: 32 covers the sublane packing of
# every dtype we may be handed (f32: 8, bf16: 16, int8/bool: 32).
ROW_GRANULE = 32


def _gen_params():
    """(max_tile_rows, tensorcore_splits) per TPU generation."""
    try:
        kind = jax.devices()[0].device_kind.lower()
    except Exception:  # pragma: no cover - defensive
        kind = ""
    if ("v5 lite" in kind) or ("v5e" in kind) or ("v5lite" in kind):
        return 2048, 1          # v5e: 1 TC, small default scoped VMEM
    if "7" in kind:             # v7x ("TPU7x"): 2 TensorCores, 64 MiB VMEM
        return 4096, 2
    return 4096, 1              # v6e & others: 1 TC, plenty of VMEM


def _masked_mse_kernel(pred_ref, target_ref, mask_ref, *out_refs,
                       tile_rows, steps, rows, needs_tail_mask, want_count):
    sq_ref = out_refs[0]
    cnt_ref = out_refs[1] if want_count else None
    i = pl.program_id(1)

    @pl.when(i == 0)
    def _init():
        sq_ref[...] = jnp.zeros_like(sq_ref)
        if want_count:
            cnt_ref[...] = jnp.zeros_like(cnt_ref)

    p = pred_ref[...].astype(jnp.float32)
    t = target_ref[...].astype(jnp.float32)
    raw_m = mask_ref[...]
    if raw_m.dtype == jnp.bool_:
        m = jnp.where(raw_m, jnp.float32(1.0), jnp.float32(0.0))
    else:
        m = raw_m.astype(jnp.float32)

    def _accumulate(d, mm):
        sq = d * d
        if tile_rows % 8 == 0:
            # Pure-VPU partial reduce into a vreg-shaped (8, cols) slab.
            sq_ref[0] += jnp.sum(sq.reshape(tile_rows // 8, 8, -1), axis=0)
            if want_count:
                cnt_ref[0] += jnp.sum(mm.reshape(tile_rows // 8, 8, -1), axis=0)
        else:
            # Single-tile odd-row case (block == full array dims).
            sq_ref[0, 0:1] += jnp.sum(sq, axis=0, keepdims=True)
            if want_count:
                cnt_ref[0, 0:1] += jnp.sum(mm, axis=0, keepdims=True)

    if not needs_tail_mask:
        _accumulate((p - t) * m, m)
    else:
        c = pl.program_id(0)
        base = (c * steps + i) * tile_rows
        is_tail = base + tile_rows > rows

        @pl.when(jnp.logical_not(is_tail))
        def _fast():
            _accumulate((p - t) * m, m)

        @pl.when(is_tail)
        def _tail():
            # Rows at or beyond `rows` (partial edge tile, or a clamped
            # duplicate tile) contribute nothing — zero both the mask and the
            # diff so garbage (possibly NaN) reads are neutralized.
            row_ids = jax.lax.broadcasted_iota(jnp.int32, (tile_rows, 1), 0)
            valid = (row_ids + base) < rows
            mm = jnp.where(valid, m, 0.0)
            d = jnp.where(valid, p - t, 0.0) * mm
            _accumulate(d, mm)


def masked_mse_loss(pred, target, mask, reduction="mean", max_tile_rows=None):
    """pred, target: float arrays (any shape); mask: bool / int / float mask."""
    assert pred.shape == target.shape == mask.shape
    total = int(pred.size)
    if total == 0:
        return jnp.float32(0.0)

    gen_rows, gen_splits = _gen_params()
    if max_tile_rows is None:
        max_tile_rows = gen_rows
    max_tile_rows = max(ROW_GRANULE, (max_tile_rows // ROW_GRANULE) * ROW_GRANULE)

    # --- choose the 2D (rows, cols) slab view -------------------------------
    natural = (pred.ndim >= 2 and pred.shape[-1] % LANES == 0
               and pred.shape[-1] <= 8192)
    if natural:
        cols = int(pred.shape[-1])
        rows = total // cols

        def _prep(x):
            return x.reshape(rows, cols)           # collapse leading dims only
    else:
        cols = LANES
        padded_total = ((total + LANES - 1) // LANES) * LANES
        rows = padded_total // LANES

        def _prep(x):
            flat = x.reshape(-1)
            if padded_total != total:
                # TODO(synk): this still materializes one copy per input when
                # size isn't a multiple of 128; a flat-index (row*128+lane <
                # total) in-kernel mask would remove it entirely.
                flat = jnp.pad(flat, (0, padded_total - total))  # zero mask
            return flat.reshape(rows, cols)

    # Mask goes through untouched (bool stays 1 B/elem in HBM).
    pred2, target2, mask2 = _prep(pred), _prep(target), _prep(mask)

    # --- tile / grid selection ----------------------------------------------
    bpe = (jnp.dtype(pred.dtype).itemsize + jnp.dtype(target.dtype).itemsize
           + jnp.dtype(mask.dtype).itemsize)
    target_elems = max_tile_rows * LANES
    cap = max(ROW_GRANULE, (target_elems // cols) // ROW_GRANULE * ROW_GRANULE)
    # Keep the double-buffered working set comfortably inside every
    # generation's scoped-VMEM budget.
    max_rows_by_vmem = max(
        ROW_GRANULE, ((12 << 20) // (cols * bpe)) // ROW_GRANULE * ROW_GRANULE)
    cap = min(cap, max_rows_by_vmem)

    tile_rows = rows if rows <= cap else cap
    total_tiles = pl.cdiv(rows, tile_rows)
    splits = max(1, min(gen_splits, total_tiles))
    steps = pl.cdiv(total_tiles, splits)
    needs_tail_mask = (splits * steps * tile_rows != rows)

    if splits * steps == total_tiles:
        def in_index(c, i):
            return (c * steps + i, 0)
    else:
        last = total_tiles - 1

        def in_index(c, i):
            # Clamp over-shooting tiles to the last valid one; the kernel's
            # validity mask zeroes their contribution.
            return (jnp.minimum(c * steps + i, last), 0)

    in_spec = pl.BlockSpec((tile_rows, cols), in_index)
    out_spec = pl.BlockSpec((1, 8, cols), lambda c, i: (c, 0, 0))
    part_shape = jax.ShapeDtypeStruct((splits, 8, cols), jnp.float32)

    want_count = (reduction == "mean")
    if want_count:
        out_shape = (part_shape, part_shape)
        out_specs = [out_spec, out_spec]
    else:
        out_shape = part_shape
        out_specs = out_spec

    tile_bytes = tile_rows * cols * bpe
    out_bytes = (2 if want_count else 1) * splits * 8 * cols * 4
    vmem_limit = int(min(max(2 * tile_bytes + 2 * out_bytes + (4 << 20),
                             16 << 20), 32 << 20))

    kernel = functools.partial(
        _masked_mse_kernel,
        tile_rows=tile_rows, steps=steps, rows=rows,
        needs_tail_mask=needs_tail_mask, want_count=want_count)

    results = pl.pallas_call(
        kernel,
        out_shape=out_shape,
        grid_spec=pltpu.PrefetchScalarGridSpec(
            num_scalar_prefetch=0,
            grid=(splits, steps),
            in_specs=[in_spec, in_spec, in_spec],
            out_specs=out_specs,
        ),
        compiler_params=pltpu.CompilerParams(
            dimension_semantics=(("parallel", "arbitrary") if splits > 1
                                 else ("arbitrary", "arbitrary")),
            vmem_limit_bytes=vmem_limit,
        ),
    )(pred2, target2, mask2)

    if want_count:
        sq_parts, cnt_parts = results
        return jnp.sum(sq_parts) / (jnp.sum(cnt_parts) + 1e-8)
    return jnp.sum(results)


if __name__ == "__main__":
    key = jax.random.PRNGKey(0)
    k1, k2, k3 = jax.random.split(key, 3)

    # NCHW, like the PyTorch module's inputs.
    B, C, H, W = 2, 4, 16, 16
    pred = jax.random.normal(k1, (B, C, H, W), dtype=jnp.float32)
    target = jax.random.normal(k2, (B, C, H, W), dtype=jnp.float32)
    mask = jax.random.bernoulli(k3, p=0.7, shape=(B, C, H, W))   # bool mask

    loss = jax.block_until_ready(masked_mse_loss(pred, target, mask, "mean"))
    m = mask.astype(jnp.float32)
    ref = jnp.sum(((pred - target) * m) ** 2) / (jnp.sum(m) + 1e-8)
    assert jnp.allclose(loss, ref, rtol=1e-5, atol=1e-6), (loss, ref)

    # 'sum' reduction (no count accumulator / output).
    loss_sum = jax.block_until_ready(masked_mse_loss(pred, target, mask, "sum"))
    ref_sum = jnp.sum(((pred - target) * m) ** 2)
    assert jnp.allclose(loss_sum, ref_sum, rtol=1e-5, atol=1e-6), (loss_sum, ref_sum)

    # Multi-tile path with a genuine partial tail tile (80 rows, tile 32).
    B2, C2, H2, W2 = 2, 4, 16, 80   # 10240 elems -> 80 rows of 128
    pred_b = jax.random.normal(k1, (B2, C2, H2, W2), dtype=jnp.float32)
    target_b = jax.random.normal(k2, (B2, C2, H2, W2), dtype=jnp.float32)
    mask_b = jax.random.bernoulli(k3, p=0.5, shape=(B2, C2, H2, W2))
    loss_b = jax.block_until_ready(
        masked_mse_loss(pred_b, target_b, mask_b, "mean", max_tile_rows=32))
    m_b = mask_b.astype(jnp.float32)
    ref_b = jnp.sum(((pred_b - target_b) * m_b) ** 2) / (jnp.sum(m_b) + 1e-8)
    assert jnp.allclose(loss_b, ref_b, rtol=1e-5, atol=1e-6), (loss_b, ref_b)

    # Natural lane-aligned trailing dim (no flatten/pad) with bf16 inputs.
    B3, C3, H3, W3 = 2, 4, 8, 128
    pred_c = jax.random.normal(k1, (B3, C3, H3, W3), dtype=jnp.bfloat16)
    target_c = jax.random.normal(k2, (B3, C3, H3, W3), dtype=jnp.bfloat16)
    mask_c = jax.random.bernoulli(k3, p=0.3, shape=(B3, C3, H3, W3))
    loss_c = jax.block_until_ready(masked_mse_loss(pred_c, target_c, mask_c, "mean"))
    m_c = mask_c.astype(jnp.float32)
    d_c = (pred_c.astype(jnp.float32) - target_c.astype(jnp.float32)) * m_c
    ref_c = jnp.sum(d_c ** 2) / (jnp.sum(m_c) + 1e-8)
    assert jnp.allclose(loss_c, ref_c, rtol=1e-3, atol=1e-5), (loss_c, ref_c)

    # Odd size (1001 elems) exercising the 128-element pad path.
    pred_d = jax.random.normal(k1, (7, 11, 13), dtype=jnp.float32)
    target_d = jax.random.normal(k2, (7, 11, 13), dtype=jnp.float32)
    mask_d = jax.random.bernoulli(k3, p=0.6, shape=(7, 11, 13))
    loss_d = jax.block_until_ready(masked_mse_loss(pred_d, target_d, mask_d, "mean"))
    m_d = mask_d.astype(jnp.float32)
    ref_d = jnp.sum(((pred_d - target_d) * m_d) ** 2) / (jnp.sum(m_d) + 1e-8)
    assert jnp.allclose(loss_d, ref_d, rtol=1e-5, atol=1e-6), (loss_d, ref_d)

    print("KERNEL_OK")
</pallas_src>

<mosaic_0001>
module attributes {stable_mosaic.version = 11 : i64} {
  func.func @_masked_mse_kernel(%arg0: i32, %arg1: i32, %arg2: memref<16x128xf32, #tpu.memory_space<vmem>>, %arg3: memref<16x128xf32, #tpu.memory_space<vmem>>, %arg4: memref<16x128xi32, #tpu.memory_space<vmem>>, %arg5: memref<1x8x128xf32, #tpu.memory_space<vmem>>, %arg6: memref<1x8x128xf32, #tpu.memory_space<vmem>>) attributes {dimension_semantics = [#tpu.dimension_semantics<arbitrary>, #tpu.dimension_semantics<arbitrary>], iteration_bounds = array<i64: 1, 1>, scalar_prefetch = 0 : i64, scratch_operands = 0 : i64, tpu.core_type = #tpu.core_type<tc>, window_params = [{transform_indices = @transform_0, window_bounds = array<i64: 16, 128>}, {transform_indices = @transform_1, window_bounds = array<i64: 16, 128>}, {transform_indices = @transform_2, window_bounds = array<i64: 16, 128>}, {transform_indices = @transform_3, window_bounds = array<i64: 1, 8, 128>}, {transform_indices = @transform_4, window_bounds = array<i64: 1, 8, 128>}]} {
    %c0_i32 = arith.constant 0 : i32
    %0 = arith.cmpi eq, %arg1, %c0_i32 : i32
    %1 = arith.extui %0 : i1 to i32
    %c0_i32_0 = arith.constant 0 : i32
    %2 = arith.cmpi ne, %1, %c0_i32_0 : i32
    scf.if %2 {
      %cst_22 = arith.constant 0.000000e+00 : f32
      %29 = vector.broadcast %cst_22 : f32 to vector<1x8x128xf32>
      %c0_23 = arith.constant 0 : index
      %c0_24 = arith.constant 0 : index
      %c0_25 = arith.constant 0 : index
      %30 = vector.load %arg5[%c0_23, %c0_24, %c0_25] : memref<1x8x128xf32, #tpu.memory_space<vmem>>, vector<1x8x128xf32>
      tpu.vector_store %arg5[%c0_23, %c0_24, %c0_25], %29 {strides = array<i32>} : memref<1x8x128xf32, #tpu.memory_space<vmem>>, vector<1x8x128xf32>,
      %cst_26 = arith.constant 0.000000e+00 : f32
      %31 = vector.broadcast %cst_26 : f32 to vector<1x8x128xf32>
      %c0_27 = arith.constant 0 : index
      %c0_28 = arith.constant 0 : index
      %c0_29 = arith.constant 0 : index
      %32 = vector.load %arg6[%c0_27, %c0_28, %c0_29] : memref<1x8x128xf32, #tpu.memory_space<vmem>>, vector<1x8x128xf32>
      tpu.vector_store %arg6[%c0_27, %c0_28, %c0_29], %31 {strides = array<i32>} : memref<1x8x128xf32, #tpu.memory_space<vmem>>, vector<1x8x128xf32>,
    } else {
    }
    %c0 = arith.constant 0 : index
    %c0_1 = arith.constant 0 : index
    %3 = vector.load %arg2[%c0, %c0_1] : memref<16x128xf32, #tpu.memory_space<vmem>>, vector<16x128xf32>
    %c0_2 = arith.constant 0 : index
    %c0_3 = arith.constant 0 : index
    %4 = vector.load %arg3[%c0_2, %c0_3] : memref<16x128xf32, #tpu.memory_space<vmem>>, vector<16x128xf32>
    %c0_4 = arith.constant 0 : index
    %c0_5 = arith.constant 0 : index
    %5 = vector.load %arg4[%c0_4, %c0_5] : memref<16x128xi32, #tpu.memory_space<vmem>>, vector<16x128xi32>
    %cst = arith.constant dense<0> : vector<16x128xi32>
    %6 = arith.cmpi ne, %5, %cst : vector<16x128xi32>
    %cst_6 = arith.constant 1.000000e+00 : f32
    %cst_7 = arith.constant 0.000000e+00 : f32
    %7 = vector.broadcast %cst_6 : f32 to vector<16x128xf32>
    %8 = vector.broadcast %cst_7 : f32 to vector<16x128xf32>
    %9 = arith.select %6, %7, %8 : vector<16x128xi1>, vector<16x128xf32>
    %10 = arith.subf %3, %4 : vector<16x128xf32>
    %11 = arith.mulf %10, %9 : vector<16x128xf32>
    %12 = arith.mulf %11, %11 : vector<16x128xf32>
    %c0_8 = arith.constant 0 : index
    %c0_9 = arith.constant 0 : index
    %c0_10 = arith.constant 0 : index
    %13 = vector.load %arg5[%c0_8, %c0_9, %c0_10] : memref<1x8x128xf32, #tpu.memory_space<vmem>>, vector<1x8x128xf32>
    %14 = vector.shape_cast %13 : vector<1x8x128xf32> to vector<8x128xf32>
    %15 = vector.shape_cast %12 : vector<16x128xf32> to vector<2x8x128xf32>
    %cst_11 = arith.constant dense<0.000000e+00> : vector<8x128xf32>
    %16 = vector.multi_reduction <add>, %15, %cst_11 [0] : vector<2x8x128xf32> to vector<8x128xf32>
    %17 = arith.addf %14, %16 : vector<8x128xf32>
    %c0_12 = arith.constant 0 : index
    %c0_13 = arith.constant 0 : index
    %c0_14 = arith.constant 0 : index
    %18 = vector.load %arg5[%c0_12, %c0_13, %c0_14] : memref<1x8x128xf32, #tpu.memory_space<vmem>>, vector<1x8x128xf32>
    %19 = vector.shape_cast %18 : vector<1x8x128xf32> to vector<8x128xf32>
    %20 = vector.shape_cast %17 : vector<8x128xf32> to vector<1x8x128xf32>
    tpu.vector_store %arg5[%c0_12, %c0_13, %c0_14], %20 {strides = array<i32>} : memref<1x8x128xf32, #tpu.memory_space<vmem>>, vector<1x8x128xf32>,
    %c0_15 = arith.constant 0 : index
    %c0_16 = arith.constant 0 : index
    %c0_17 = arith.constant 0 : index
    %21 = vector.load %arg6[%c0_15, %c0_16, %c0_17] : memref<1x8x128xf32, #tpu.memory_space<vmem>>, vector<1x8x128xf32>
    %22 = vector.shape_cast %21 : vector<1x8x128xf32> to vector<8x128xf32>
    %23 = vector.shape_cast %9 : vector<16x128xf32> to vector<2x8x128xf32>
    %cst_18 = arith.constant dense<0.000000e+00> : vector<8x128xf32>
    %24 = vector.multi_reduction <add>, %23, %cst_18 [0] : vector<2x8x128xf32> to vector<8x128xf32>
    %25 = arith.addf %22, %24 : vector<8x128xf32>
    %c0_19 = arith.constant 0 : index
    %c0_20 = arith.constant 0 : index
    %c0_21 = arith.constant 0 : index
    %26 = vector.load %arg6[%c0_19, %c0_20, %c0_21] : memref<1x8x128xf32, #tpu.memory_space<vmem>>, vector<1x8x128xf32>
    %27 = vector.shape_cast %26 : vector<1x8x128xf32> to vector<8x128xf32>
    %28 = vector.shape_cast %25 : vector<8x128xf32> to vector<1x8x128xf32>
    tpu.vector_store %arg6[%c0_19, %c0_20, %c0_21], %28 {strides = array<i32>} : memref<1x8x128xf32, #tpu.memory_space<vmem>>, vector<1x8x128xf32>,
    return
  }
  func.func @transform_0(%arg0: i32, %arg1: i32) -> (i32, i32) {
    %c1_i32 = arith.constant 1 : i32
    %0 = arith.muli %arg0, %c1_i32 : i32
    %1 = arith.addi %0, %arg1 : i32
    %c0_i32 = arith.constant 0 : i32
    %c0_i32_0 = arith.constant 0 : i32
    return %1, %c0_i32 : i32, i32
  }
  func.func @transform_1(%arg0: i32, %arg1: i32) -> (i32, i32) {
    %c1_i32 = arith.constant 1 : i32
    %0 = arith.muli %arg0, %c1_i32 : i32
    %1 = arith.addi %0, %arg1 : i32
    %c0_i32 = arith.constant 0 : i32
    %c0_i32_0 = arith.constant 0 : i32
    return %1, %c0_i32 : i32, i32
  }
  func.func @transform_2(%arg0: i32, %arg1: i32) -> (i32, i32) {
    %c1_i32 = arith.constant 1 : i32
    %0 = arith.muli %arg0, %c1_i32 : i32
    %1 = arith.addi %0, %arg1 : i32
    %c0_i32 = arith.constant 0 : i32
    %c0_i32_0 = arith.constant 0 : i32
    return %1, %c0_i32 : i32, i32
  }
  func.func @transform_3(%arg0: i32, %arg1: i32) -> (i32, i32, i32) {
    %c0_i32 = arith.constant 0 : i32
    %c0_i32_0 = arith.constant 0 : i32
    %c0_i32_1 = arith.constant 0 : i32
    return %arg0, %c0_i32, %c0_i32_0 : i32, i32, i32
  }
  func.func @transform_4(%arg0: i32, %arg1: i32) -> (i32, i32, i32) {
    %c0_i32 = arith.constant 0 : i32
    %c0_i32_0 = arith.constant 0 : i32
    %c0_i32_1 = arith.constant 0 : i32
    return %arg0, %c0_i32, %c0_i32_0 : i32, i32, i32
  }
}

</mosaic_0001>

<bundles_post_ra>
// kernel: tpu_custom_call.1
= control target key start
LH: loop header
LB: loop body
LE: loop exit
PB: predicated region body
PF: predicated region fallthrough
CT: control target
= control target key end

     0   :  { %10 = vsyncpa [#allocation3], 0  ;;  %s295_s0 = inlined_call_operand.vmem [shape: f32[16,128], index: 0, kind: input, shape index: {}]   ;;  %s296_s1 = inlined_call_operand.hbm [shape: f32[16,128], index: 1, kind: input, shape index: {}]   ;;  %s297_s2 = inlined_call_operand.vmem [shape: s32[16,128], index: 2, kind: input, shape index: {}]   ;;  %s298_s3 = inlined_call_operand.hbm [shape: f32[1,8,128], index: 3, kind: output, shape index: {0}]   ;;  %s299_s4 = inlined_call_operand.hbm [shape: f32[1,8,128], index: 4, kind: output, shape index: {1}]  }
   0x1   :  { %11 = vsyncpa [#allocation4], 0 }
   0x2   :  { %12 = vsyncpa [#allocation7], 0  ;;  %s31_s17 = sshll.u32 %s296_s1, 4  ;;  %s243_s18 = smov [#allocation2]   ;;  %s32_s17 = int_to_ptr.hbm [resolvable:$true] %s31_s17 }
   0x3   :  { %s33_s19 = sshll.u32 %s243_s18, 4  ;;  %s244_s20 = smov 128   ;;  %s34_s19 = int_to_ptr.vmem [resolvable:$true] %s33_s19 }
   0x4   :  { %s245_s21 = smov 8  }
   0x5   :  { %39 = dma.hbm_to_vmem [thread:$0]  %s32_s17, 256, %s34_s19, [#allocation3], %s244_s20, %s244_s20, %s245_s21  }
   0x6   :  { %237 = dma.done.wait [#allocation3], 256  }
   0x7   :  { %238 = vsyncadd [#allocation3], 4294967040  ;;  %v90_v0 = vld [vmem:[%s295_s0] sm:$0xff]  ;;  %v91_v1 = vld [vmem:[%s295_s0 + $0x8] sm:$0xff]  ;;  %v246_v8 = vmov 0.0   ;;  %s247_s29 = smov [#allocation6]  }
   0x8   :  { %v92_v2 = vld [vmem:[#allocation2] sm:$0xff]  ;;  %v93_v3 = vld [vmem:[#allocation2 + $0x8] sm:$0xff]  ;;  %s130_s30 = sshll.u32 %s247_s29, 4  ;;  %s132_s6 = sshll.u32 %s299_s4, 4  ;;  %s131_s30 = int_to_ptr.vmem [resolvable:$true] %s130_s30  ;;  %s133_s6 = int_to_ptr.hbm [resolvable:$true] %s132_s6 }
   0x9   :  { %v94_v4 = vld [vmem:[%s297_s2] sm:$0xff]  ;;  %v95_v5 = vld [vmem:[%s297_s2 + $0x8] sm:$0xff]  ;;  %v100_v6 = vsub.f32 %v90_v0, %v92_v2  ;;  %v101_v7 = vsub.f32 %v91_v1, %v93_v3  ;;  %s248_s2 = smov [#allocation5]   ;;  %s121_s10 = sshll.u32 %s298_s3, 4  ;;  %s122_s10 = int_to_ptr.hbm [resolvable:$true] %s121_s10 }
   0xa   :  { %vm96_vm0 = vcmp.ne.s32.totalorder %v94_v4, 0  ;;  %vm97_vm1 = vcmp.ne.s32.totalorder %v95_v5, 0  ;;  %s119_s7 = sshll.u32 %s248_s2, 4  ;;  %s120_s7 = int_to_ptr.vmem [resolvable:$true] %s119_s7 }
   0xb   :  { %v98_v9 = vsel %vm96_vm0, 1.0, %v246_v8  ;;  %v99_v10 = vsel %vm97_vm1, 1.0, %v246_v8 }
   0xc   :  { %v102_v11 = vmul.f32 %v100_v6, %v98_v9  ;;  %v103_v12 = vmul.f32 %v101_v7, %v99_v10  ;;  %v111_v13 = vadd.f32 %v99_v10, %v98_v9 }
   0xe   :  { %v104_v14 = vmul.f32 %v102_v11, %v102_v11  ;;  %v105_v15 = vmul.f32 %v103_v12, %v103_v12  ;;  %113 = vst [vmem:[#allocation6] sm:$0xff] %v111_v13 }
   0xf   :  { %135 = dma.vmem_to_hbm [thread:$0]  %s131_s30, 128, %s133_s6, [#allocation7]  }
  0x10   :  { %v107_v16 = vadd.f32 %v105_v15, %v104_v14 }
  0x12   :  { %109 = vst [vmem:[#allocation5] sm:$0xff] %v107_v16 }
  0x13   :  { %124 = dma.vmem_to_hbm [thread:$0]  %s120_s7, 128, %s122_s10, [#allocation4]  }
  0x14   :  { %239 = dma.done.wait [#allocation4], 128  }
  0x15   :  { %240 = vsyncadd [#allocation4], 4294967168 }
  0x16   :  { %241 = dma.done.wait [#allocation7], 128  }
  0x17   :  { %242 = vsyncadd [#allocation7], 4294967168 }
  0x18   :  { %144 = vsyncpa [#allocation3], 1 }
  0x19   :  { %145 = vsyncpa [#allocation4], 1 }
  0x1a   :  { %146 = vsyncpa [#allocation7], 1 }

</bundles_post_ra>
